<compile_context>
chip_gen: v5e
topology: v5e:2x2
jax: 0.10.0
libtpu: 0.0.40
codegen_flags: <defaults>
</compile_context>

<pallas_src>
import jax
import jax.numpy as jnp
from jax.experimental import pallas as pl
from jax.experimental.pallas import tpu as pltpu


def _round_up(x, m):
    return (x + m - 1) // m * m


# --------------------------------------------------------------------------
# Kernel 1: sm = softmax(W.T + b) over the D_in axis, computed ONCE per call.
# Layout is (K_pad, N_pad) = (D_in_pad, D_out_pad): torch's softmax dim 0 is
# the sublane axis here, so the result feeds the hot loop with no transpose.
# --------------------------------------------------------------------------
def softmax_weights_kernel(wt_ref, b_ref, sm_ref):
    # wt_ref: (K_pad, N_pad), padded K rows are -1e30; b_ref: (1, N_pad)
    ps = wt_ref[...].astype(jnp.float32) + b_ref[...].astype(jnp.float32)
    ps = ps - jnp.max(ps, axis=0, keepdims=True)        # stabilized
    e = jnp.exp(ps)                                     # padded K rows -> 0
    denom = jnp.sum(e, axis=0, keepdims=True)
    # Hoisted out of the batched hot loop, so exact reciprocal is free here.
    sm_ref[...] = (e * pl.reciprocal(denom, approx=False)).astype(sm_ref.dtype)


# --------------------------------------------------------------------------
# Kernel 2: out[b, n] = sum_k x[b, k] * sm[k, n]   (plain NN matmul on MXU)
# --------------------------------------------------------------------------
def combo_matmul_kernel(x_ref, sm_ref, o_ref):
    o_ref[...] = jnp.dot(
        x_ref[...], sm_ref[...], preferred_element_type=jnp.float32
    ).astype(o_ref.dtype)


def convex_combo(x, w, b, *, max_batch_tile=512, vmem_budget_bytes=24 << 20):
    """x: (..., D_in); w: (D_out, D_in) like torch Linear.weight; b: (D_out,)."""
    orig_dtype = x.dtype
    *lead, D_in = x.shape
    D_out = w.shape[0]
    x2 = x.reshape(-1, D_in)
    B = x2.shape[0]

    # bf16 activations -> bf16 MXU operands (v6e/v7x); everything else in f32.
    compute_dtype = jnp.bfloat16 if orig_dtype == jnp.bfloat16 else jnp.float32
    x2 = x2.astype(compute_dtype)
    act_bytes = jnp.dtype(compute_dtype).itemsize

    # Padded sizes: K -> sublane multiple (8); N -> lane multiple (128) so the
    # output store is a full-lane unmasked vst.
    K_pad = _round_up(D_in, 8)
    N_pad = _round_up(D_out, 128)

    # Batch tile: as large as fits a conservative VMEM budget
    # (double-buffered x and out tiles + resident softmax weights).
    resident = K_pad * N_pad * act_bytes
    per_row = 2 * (K_pad + N_pad) * act_bytes
    tb_cap = max(8, (vmem_budget_bytes - resident) // max(per_row, 1))
    TB = min(max_batch_tile, _round_up(B, 8), max(8, (tb_cap // 8) * 8))
    num_tiles = pl.cdiv(B, TB)
    B_pad = num_tiles * TB

    # Layout plumbing (input-independent, tiny): present W.T in (K_pad, N_pad).
    # Pad K rows with -1e30 (exactly-zero softmax weight); N cols / B with 0.
    wt = jnp.transpose(w.astype(jnp.float32))                       # (D_in, D_out)
    wt_p = jnp.pad(wt, ((0, K_pad - D_in), (0, 0)), constant_values=-1e30)
    wt_p = jnp.pad(wt_p, ((0, 0), (0, N_pad - D_out)))
    b_p = jnp.pad(b.astype(jnp.float32), (0, N_pad - D_out)).reshape(1, N_pad)
    x_p = jnp.pad(x2, ((0, B_pad - B), (0, K_pad - D_in)))

    # ---- pass 1: input-independent softmax weights (tiny, one shot) ----
    sm = pl.pallas_call(
        softmax_weights_kernel,
        out_shape=jax.ShapeDtypeStruct((K_pad, N_pad), compute_dtype),
        in_specs=[
            pl.BlockSpec((K_pad, N_pad), lambda: (0, 0)),
            pl.BlockSpec((1, N_pad), lambda: (0, 0)),
        ],
        out_specs=pl.BlockSpec((K_pad, N_pad), lambda: (0, 0)),
        cost_estimate=pl.CostEstimate(
            flops=4 * K_pad * N_pad,
            transcendentals=K_pad * N_pad,
            bytes_accessed=K_pad * N_pad * 4 + N_pad * 4
                           + K_pad * N_pad * act_bytes,
        ),
    )(wt_p, b_p)

    # ---- pass 2: batch-gridded matmul against the resident softmax weights ----
    out_p = pl.pallas_call(
        combo_matmul_kernel,
        out_shape=jax.ShapeDtypeStruct((B_pad, N_pad), compute_dtype),
        grid=(num_tiles,),
        in_specs=[
            pl.BlockSpec((TB, K_pad), lambda i: (i, 0)),
            pl.BlockSpec((K_pad, N_pad), lambda i: (0, 0)),  # VMEM-resident weights
        ],
        out_specs=pl.BlockSpec((TB, N_pad), lambda i: (i, 0)),
        compiler_params=pltpu.CompilerParams(
            dimension_semantics=("parallel",),      # megacore sharding on v7x
            vmem_limit_bytes=32 * 1024 * 1024,      # safe on v5e/v6e/v7x
        ),
        cost_estimate=pl.CostEstimate(
            flops=2 * B_pad * K_pad * N_pad,
            transcendentals=0,
            bytes_accessed=(B_pad * K_pad * act_bytes
                            + K_pad * N_pad * act_bytes
                            + B_pad * N_pad * act_bytes),
        ),
    )(x_p, sm)

    out = out_p[:B, :D_out].astype(orig_dtype)
    return out.reshape(*lead, D_out)


if __name__ == "__main__":
    key = jax.random.PRNGKey(0)
    kx, kw, kb = jax.random.split(key, 3)

    B, D_in, D_out = 8, 32, 16

    # Deterministic init (mimics torch.nn.Linear uniform(-1/sqrt(D_in), 1/sqrt(D_in)))
    bound = 1.0 / (D_in ** 0.5)
    w = jax.random.uniform(kw, (D_out, D_in), jnp.float32, -bound, bound)
    b = jax.random.uniform(kb, (D_out,), jnp.float32, -bound, bound)
    x = jax.random.normal(kx, (B, D_in), jnp.float32)

    combo = jax.jit(convex_combo)
    out = jax.block_until_ready(combo(x, w, b))

    # Pure-JAX reference (matches the torch forward)
    ps = w.T + b[None, :]
    ref = x @ jax.nn.softmax(ps, axis=0)

    assert out.shape == (B, D_out)
    err = float(jnp.max(jnp.abs(out - ref)))
    assert jnp.allclose(out, ref, atol=1e-5, rtol=1e-5), f"max abs err {err}"
    print("KERNEL_OK")
</pallas_src>

<mosaic_0001>
module attributes {stable_mosaic.version = 11 : i64} {
  func.func @softmax_weights_kernel(%arg0: memref<32x128xf32, #tpu.memory_space<vmem>>, %arg1: memref<1x128xf32, #tpu.memory_space<vmem>>, %arg2: memref<32x128xf32, #tpu.memory_space<vmem>>) attributes {dimension_semantics = [], scalar_prefetch = 0 : i64, scratch_operands = 0 : i64, tpu.core_type = #tpu.core_type<tc>} {
    %c0 = arith.constant 0 : index
    %c0_0 = arith.constant 0 : index
    %0 = vector.load %arg0[%c0, %c0_0] : memref<32x128xf32, #tpu.memory_space<vmem>>, vector<32x128xf32>
    %c0_1 = arith.constant 0 : index
    %c0_2 = arith.constant 0 : index
    %1 = vector.load %arg1[%c0_1, %c0_2] : memref<1x128xf32, #tpu.memory_space<vmem>>, vector<1x128xf32>
    %2 = vector.broadcast %1 : vector<1x128xf32> to vector<32x128xf32>
    %3 = arith.addf %0, %2 : vector<32x128xf32>
    %cst = arith.constant dense<0xFF800000> : vector<128xf32>
    %4 = vector.multi_reduction <maximumf>, %3, %cst [0] : vector<32x128xf32> to vector<128xf32>
    %5 = vector.shape_cast %4 : vector<128xf32> to vector<1x128xf32>
    %6 = vector.broadcast %5 : vector<1x128xf32> to vector<32x128xf32>
    %7 = arith.subf %3, %6 : vector<32x128xf32>
    %8 = math.exp %7 : vector<32x128xf32>
    %cst_3 = arith.constant dense<0.000000e+00> : vector<128xf32>
    %9 = vector.multi_reduction <add>, %8, %cst_3 [0] : vector<32x128xf32> to vector<128xf32>
    %10 = vector.shape_cast %9 : vector<128xf32> to vector<1x128xf32>
    %11 = tpu.reciprocal %10 : vector<1x128xf32> -> vector<1x128xf32>
    %12 = vector.broadcast %11 : vector<1x128xf32> to vector<32x128xf32>
    %13 = arith.mulf %8, %12 : vector<32x128xf32>
    %c0_4 = arith.constant 0 : index
    %c0_5 = arith.constant 0 : index
    %14 = vector.load %arg2[%c0_4, %c0_5] : memref<32x128xf32, #tpu.memory_space<vmem>>, vector<32x128xf32>
    tpu.vector_store %arg2[%c0_4, %c0_5], %13 {strides = array<i32>} : memref<32x128xf32, #tpu.memory_space<vmem>>, vector<32x128xf32>,
    return
  }
}

module attributes {stable_mosaic.version = 11 : i64} {
  func.func @combo_matmul_kernel(%arg0: i32, %arg1: memref<8x32xf32, #tpu.memory_space<vmem>>, %arg2: memref<32x128xf32, #tpu.memory_space<vmem>>, %arg3: memref<8x128xf32, #tpu.memory_space<vmem>>) attributes {dimension_semantics = [#tpu.dimension_semantics<parallel>], iteration_bounds = array<i64: 1>, scalar_prefetch = 0 : i64, scratch_operands = 0 : i64, tpu.core_type = #tpu.core_type<tc>, window_params = [{transform_indices = @transform_0, window_bounds = array<i64: 8, 32>}, {pipeline_mode = #tpu.pipeline_mode<synchronous>, transform_indices = @transform_1, window_bounds = array<i64: 32, 128>}, {transform_indices = @transform_2, window_bounds = array<i64: 8, 128>}]} {
    %c0 = arith.constant 0 : index
    %c0_0 = arith.constant 0 : index
    %0 = vector.load %arg1[%c0, %c0_0] : memref<8x32xf32, #tpu.memory_space<vmem>>, vector<8x32xf32>
    %c0_1 = arith.constant 0 : index
    %c0_2 = arith.constant 0 : index
    %1 = vector.load %arg2[%c0_1, %c0_2] : memref<32x128xf32, #tpu.memory_space<vmem>>, vector<32x128xf32>
    %cst = arith.constant dense<0.000000e+00> : vector<8x128xf32>
    %2 = tpu.matmul %0, %1, %cst {dimension_numbers = #tpu.dot_dimension_numbers<[1], [0], [0], [1], [0, 0, 1, 1], [], []>} : vector<8x32xf32>, vector<32x128xf32>, vector<8x128xf32> -> vector<8x128xf32>
    %c0_3 = arith.constant 0 : index
    %c0_4 = arith.constant 0 : index
    %3 = vector.load %arg3[%c0_3, %c0_4] : memref<8x128xf32, #tpu.memory_space<vmem>>, vector<8x128xf32>
    tpu.vector_store %arg3[%c0_3, %c0_4], %2 {strides = array<i32>} : memref<8x128xf32, #tpu.memory_space<vmem>>, vector<8x128xf32>,
    return
  }
  func.func @transform_0(%arg0: i32) -> (i32, i32) {
    %c0_i32 = arith.constant 0 : i32
    %c0_i32_0 = arith.constant 0 : i32
    return %arg0, %c0_i32 : i32, i32
  }
  func.func @transform_1(%arg0: i32) -> (i32, i32) {
    %c0_i32 = arith.constant 0 : i32
    %c0_i32_0 = arith.constant 0 : i32
    %c0_i32_1 = arith.constant 0 : i32
    return %c0_i32, %c0_i32_0 : i32, i32
  }
  func.func @transform_2(%arg0: i32) -> (i32, i32) {
    %c0_i32 = arith.constant 0 : i32
    %c0_i32_0 = arith.constant 0 : i32
    return %arg0, %c0_i32 : i32, i32
  }
}

</mosaic_0001>

<bundles_post_ra>
// kernel: convex_combo.3
= control target key start
LH: loop header
LB: loop body
LE: loop exit
PB: predicated region body
PF: predicated region fallthrough
CT: control target
= control target key end

     0   :  { %s120_s0 = inlined_call_operand.vmem [shape: f32[8,32], index: 0, kind: input, shape index: {}]   ;;  %s121_s1 = inlined_call_operand.vmem [shape: f32[32,128], index: 1, kind: input, shape index: {}]   ;;  %s122_s2 = inlined_call_operand.hbm [shape: f32[8,128], index: 2, kind: output, shape index: {}]  }
   0x1   :  { %v16_v0 = vld [vmem:[%s121_s1 + $0x18] sm:$0xff]  ;;  %v15_v1 = vld [vmem:[%s121_s1 + $0x10] sm:$0xff] }
   0x2   :  { %33 = vmatpush.msra.mxu0 %v16_v0 }
   0x3   :  { %7 = vsyncpa [#allocation3], 0  ;;  %v14_v2 = vld [vmem:[%s121_s1 + $0x8] sm:$0xff]  ;;  %v13_v3 = vld [vmem:[%s121_s1] sm:$0xff]  ;;  %vm17_vm0 = vcmask 261120   ;;  %s86_s19 = smov [#allocation2]  }
   0x4   :  { %34 = vmatpush.msra.mxu0 %v15_v1  ;;  %v12_v4 = vld [vmem:[%s120_s0] sm:$0xff]  ;;  %s47_s20 = sshll.u32 %s86_s19, 4  ;;  %s49_s23 = sshll.u32 %s122_s2, 4  ;;  %s48_s20 = int_to_ptr.vmem [resolvable:$true] %s47_s20  ;;  %s50_s23 = int_to_ptr.hbm [resolvable:$true] %s49_s23 }
   0x6   :  { %35 = vmatpush.msra.mxu0 %v14_v2 }
   0x8   :  { %36 = vmatpush.msra.mxu0 %v13_v3 }
   0x9   :  { %58 = vmatmul.msk.f32.vlgmr.msra.gmra.mxu0 %vm17_vm0, %v12_v4 }
  0x86   :  { %v38_v5 = vpop.f32.mrf.mxu0 }
  0x87   :  { %41 = vst [vmem:[#allocation2] sm:$0xff] %v38_v5 }
  0x88   :  { %52 = dma.vmem_to_hbm [thread:$0]  %s48_s20, 128, %s50_s23, [#allocation3]  }
  0x89   :  { %84 = dma.done.wait [#allocation3], 128  }
  0x8a   :  { %85 = vsyncadd [#allocation3], 4294967168 }
  0x8b   :  { %57 = vsyncpa [#allocation3], 1 }

// kernel: convex_combo.2
= control target key start
LH: loop header
LB: loop body
LE: loop exit
PB: predicated region body
PF: predicated region fallthrough
CT: control target
= control target key end

     0   :  { %s132_s0 = inlined_call_operand.vmem [shape: f32[32,128], index: 0, kind: input, shape index: {}]   ;;  %s133_s1 = inlined_call_operand.vmem [shape: f32[1,128], index: 1, kind: input, shape index: {}]   ;;  %s134_s2 = inlined_call_operand.vmem [shape: f32[32,128], index: 2, kind: output, shape index: {}]  }
   0x1   :  { %v11_v0 = vld [vmem:[%s132_s0] sm:$0xff]  ;;  %v12_v1 = vld [vmem:[%s132_s0 + $0x8] sm:$0xff]  ;;  %v13_v2 = vld [vmem:[%s132_s0 + $0x10] sm:$0xff] }
   0x2   :  { %v14_v3 = vld [vmem:[%s132_s0 + $0x18] sm:$0xff]  ;;  %v79_v4 = vld [vmem:[%s133_s1] ss:$0 sm:$0xff] }
   0x3   :  { %v19_v5 = vadd.f32 %v79_v4, %v11_v0  ;;  %v20_v6 = vadd.f32 %v79_v4, %v12_v1  ;;  %v21_v7 = vadd.f32 %v79_v4, %v13_v2  ;;  %v22_v8 = vadd.f32 %v79_v4, %v14_v3 }
   0x5   :  { %v23_v9 = vmax.f32 %v19_v5, %v20_v6  ;;  %v24_v10 = vmax.f32 %v21_v7, %v22_v8 }
   0x7   :  { %v25_v11 = vmax.f32 %v23_v9, %v24_v10 }
   0x9   :  { %v26_v12 = vrot.slane %v25_v11, 4 }
   0xb   :  { %v27_v13 = vmax.f32 %v25_v11, %v26_v12 }
   0xd   :  { %v28_v14 = vrot.slane %v27_v13, 2 }
   0xf   :  { %v29_v15 = vmax.f32 %v27_v13, %v28_v14 }
  0x11   :  { %v30_v16 = vrot.slane %v29_v15, 1 }
  0x13   :  { %v31_v17 = vmax.f32 %v29_v15, %v30_v16 }
  0x15   :  { %v32_v18 = vsub.f32 %v19_v5, %v31_v17  ;;  %v33_v19 = vsub.f32 %v20_v6, %v31_v17  ;;  %v34_v20 = vsub.f32 %v21_v7, %v31_v17  ;;  %v35_v21 = vsub.f32 %v22_v8, %v31_v17 }
  0x17   :  { %v36_v22 = vmul.f32 1.442695, %v32_v18  ;;  %v38_v23 = vmul.f32 1.442695, %v33_v19  ;;  %v40_v24 = vmul.f32 1.442695, %v34_v20 }
  0x18   :  { %v42_v25 = vmul.f32 1.442695, %v35_v21 }
  0x19   :  { %80 = vpow2.f32 %v36_v22 }
  0x1a   :  { %82 = vpow2.f32 %v38_v23 }
  0x1b   :  { %84 = vpow2.f32 %v40_v24 }
  0x1c   :  { %86 = vpow2.f32 %v42_v25 }
  0x1f   :  { %v81_v26 = vpop.eup %80 }
  0x20   :  { %v83_v27 = vpop.eup %82 }
  0x21   :  { %v85_v28 = vpop.eup %84  ;;  %v44_v29 = vadd.f32 %v83_v27, %v81_v26 }
  0x22   :  { %v87_v30 = vpop.eup %86 }
  0x23   :  { %v45_v31 = vadd.f32 %v85_v28, %v44_v29 }
  0x25   :  { %v46_v32 = vadd.f32 %v87_v30, %v45_v31 }
  0x27   :  { %v47_v33 = vrot.slane %v46_v32, 4 }
  0x29   :  { %v48_v34 = vadd.f32 %v47_v33, %v46_v32 }
  0x2b   :  { %v49_v35 = vrot.slane %v48_v34, 2 }
  0x2d   :  { %v50_v36 = vadd.f32 %v49_v35, %v48_v34 }
  0x2f   :  { %v51_v37 = vrot.slane %v50_v36, 1 }
  0x31   :  { %v52_v38 = vadd.f32 %v51_v37, %v50_v36 }
  0x33   :  { %88 = vrcp.f32 %v52_v38  ;;  %v64_v41 = vand.u32 2147483648, %v52_v38  ;;  %vm58_vm0 = vweird.f32 %v52_v38  ;;  %v62_v43 = vand.u32 2147483647, %v52_v38 }
  0x35   :  { %v65_v45 = vor.u32 1.1754944e-38, %v64_v41  ;;  %vm63_vm3 = vcmp.eq.f32.partialorder %v62_v43, 8.507059e+37 }
  0x39   :  { %v89_v39 = vpop.eup %88 }
  0x3a   :  { %v54_v40 = vmul.f32 %v89_v39, %v52_v38  ;;  %vm59_vm1 = vweird.f32 %v89_v39 }
  0x3b   :  { %vm60_vm2 = vmor %vm58_vm0, %vm59_vm1 }
  0x3c   :  { %v55_v42 = vsub.f32 1.0, %v54_v40 }
  0x3e   :  { %v56_v44 = vmul.f32 %v89_v39, %v55_v42 }
  0x40   :  { %v57_v46 = vadd.f32 %v89_v39, %v56_v44 }
  0x42   :  { %v61_v47 = vsel %vm60_vm2, %v89_v39, %v57_v46 }
  0x43   :  { %v66_v48 = vsel %vm63_vm3, %v65_v45, %v61_v47 }
  0x44   :  { %v67_v49 = vmul.f32 %v81_v26, %v66_v48  ;;  %v68_v50 = vmul.f32 %v83_v27, %v66_v48  ;;  %v69_v51 = vmul.f32 %v85_v28, %v66_v48  ;;  %v70_v52 = vmul.f32 %v87_v30, %v66_v48 }
  0x46   :  { %71 = vst [vmem:[%s134_s2] sm:$0xff] %v67_v49 }
  0x47   :  { %72 = vst [vmem:[%s134_s2 + $0x8] sm:$0xff] %v68_v50 }
  0x48   :  { %73 = vst [vmem:[%s134_s2 + $0x10] sm:$0xff] %v69_v51 }
  0x49   :  { %74 = vst [vmem:[%s134_s2 + $0x18] sm:$0xff] %v70_v52 }

</bundles_post_ra>
